<compile_context>
chip_gen: v5e
topology: v5e:2x2
jax: 0.10.0
libtpu: 0.0.40
codegen_flags: <defaults>
</compile_context>

<pallas_src>
import functools

import jax
import jax.numpy as jnp
import numpy as np
from jax.experimental import pallas as pl
from jax.experimental.pallas import tpu as pltpu

# ----------------------------- config (small synthetic shapes) ----------------
BATCH = 2
SEQ = 8            # MAX_ITEM_LIST_LENGTH
HIDDEN = 32
LN_EPS = 1e-12     # matches nn.LayerNorm(hidden, eps=1e-12) in the reference

CONFIG = {
    'n_layers': 2,
    'MAX_ITEM_LIST_LENGTH': SEQ,
    'filter_mixer': 'M',
    'dynamic_ratio': 0.6,
    'slide_mode': 'one',
    'attn_dropout_prob': 0.5,   # nn.Dropout is identity at inference
    'residual': True,
}
LAYER_INDEX = 0                 # the `i` this FilterMixerLayer instance gets


# ----------------------------- shared math -------------------------------------
def layernorm(x, gamma, beta, eps=LN_EPS):
    mean = jnp.mean(x, axis=-1, keepdims=True)
    var = jnp.mean((x - mean) ** 2, axis=-1, keepdims=True)
    return (x - mean) * jax.lax.rsqrt(var + eps) * gamma + beta


# ----------------------------- Pallas kernel -----------------------------------
def filter_mixer_kernel(x_ref, fcat_ref, bcat_ref, wr_ref, wi_ref,
                        g_ref, b_ref, o_ref, *, fk, residual):
    """One grid step = one batch block; all parameters are VMEM-resident."""
    fcat = fcat_ref[...]                      # (2*fk, S)  bf16  [Fr; Fi]
    bcat = bcat_ref[...]                      # (S, 2*fk)  bf16  [Br | Bi]
    wr = wr_ref[...]                          # (fk, H)    f32 (band mask folded in)
    wi = wi_ref[...]                          # (fk, H)    f32
    gamma = g_ref[...]                        # (1, H)
    beta = b_ref[...]                         # (1, H)

    b_blk = x_ref.shape[0]
    # Short static loop over the batch rows of this block: keeps the DFT
    # matrices shared (no kron block-diagonal) and each matmul a plain 2-D dot.
    for b in range(b_blk):
        xb = x_ref[b]                                            # (S, H) f32
        # rfft(ortho) as one real matmul: rows [:fk]=real, [fk:]=imag part.
        s = jnp.dot(fcat, xb.astype(jnp.bfloat16),
                    preferred_element_type=jnp.float32)          # (2*fk, H)
        sr, si = s[:fk], s[fk:]
        # band-masked complex weight multiply (masks already folded into wr/wi)
        yr = wr * sr - wi * si
        yi = wi * sr + wr * si
        yz = jnp.concatenate([yr, yi], axis=0).astype(jnp.bfloat16)
        # irfft(ortho) as one real matmul
        y = jnp.dot(bcat, yz, preferred_element_type=jnp.float32)  # (S, H)
        # dropout(eval) = identity; residual LayerNorm
        h = y + xb if residual else y
        o_ref[b] = layernorm(h, gamma, beta)


# ----------------------------- parameter / operator setup ----------------------
def filter_bounds(config, i):
    """Mirror FilterMixerLayer.__init__ index arithmetic exactly."""
    F = config['MAX_ITEM_LIST_LENGTH'] // 2 + 1
    n_layers = config['n_layers']
    dynamic_ratio = config['dynamic_ratio']
    slide_step = F * (1 - dynamic_ratio) // (n_layers - 1)
    static_ratio = 1 / n_layers
    filter_size = static_ratio * F
    sm = config['slide_mode']
    if sm == 'one':
        G_i, L_i = i, n_layers - 1 - i
    elif sm == 'two':
        G_i, L_i = n_layers - 1 - i, i
    elif sm == 'three':
        G_i, L_i = n_layers - 1 - i, n_layers - 1 - i
    else:  # 'four'
        G_i, L_i = i, i
    fm = config['filter_mixer']
    bounds = {}
    if fm in ('G', 'M'):
        bounds['G'] = (int(F * (1 - dynamic_ratio) - G_i * slide_step),
                       int(F - G_i * slide_step))
    if fm in ('L', 'M'):
        bounds['L'] = (int(F * (1 - static_ratio) - L_i * filter_size),
                       int(F - L_i * filter_size))
    return bounds


def band_mask_np(F, left, right):
    k = np.arange(F)
    return ((k >= left) & (k < right)).astype(np.float32)


def build_spectral_operator(seq, keep, dtype=jnp.bfloat16):
    """Real matrices so  y = [Br|Bi] @ complex_mult([Fr;Fi] @ x)  equals
    irfft(rfft(x, ortho) * W, ortho), restricted to the kept frequencies."""
    scale = 1.0 / np.sqrt(seq)
    n = np.arange(seq, dtype=np.float64)
    k = keep.astype(np.float64)
    theta = 2.0 * np.pi * np.outer(k, n) / seq                  # (fk, S)
    Fr = np.cos(theta) * scale
    Fi = -np.sin(theta) * scale
    c = np.where((keep == 0) | ((seq % 2 == 0) & (keep == seq // 2)), 1.0, 2.0)
    Br = (np.cos(theta) * c[:, None] * scale).T                 # (S, fk)
    Bi = (-np.sin(theta) * c[:, None] * scale).T
    fk = keep.size
    fk_pad = -(-fk // 8) * 8                                    # sublane-align
    pad = fk_pad - fk
    Fr = np.pad(Fr, ((0, pad), (0, 0)))
    Fi = np.pad(Fi, ((0, pad), (0, 0)))
    Br = np.pad(Br, ((0, 0), (0, pad)))
    Bi = np.pad(Bi, ((0, 0), (0, pad)))
    fcat = np.concatenate([Fr, Fi], axis=0)                     # (2*fk_pad, S)
    bcat = np.concatenate([Br, Bi], axis=1)                     # (S, 2*fk_pad)
    return jnp.asarray(fcat, dtype), jnp.asarray(bcat, dtype), fk_pad


def make_params(key, i, config, hidden):
    seq = config['MAX_ITEM_LIST_LENGTH']
    F = seq // 2 + 1
    fm = config['filter_mixer']
    ks = jax.random.split(key, 3)
    # complex_weight params: randn(1, F, H, 2) * 0.02 in the torch module
    cw = jax.random.normal(ks[0], (F, hidden, 2), jnp.float32) * 0.02
    cw_g = jax.random.normal(ks[1], (F, hidden, 2), jnp.float32) * 0.02
    cw_l = jax.random.normal(ks[2], (F, hidden, 2), jnp.float32) * 0.02

    bounds = filter_bounds(config, i)
    if fm == 'M':
        mg = band_mask_np(F, *bounds['G'])
        ml = band_mask_np(F, *bounds['L'])
        w_r = jnp.asarray(mg)[:, None] * cw_g[..., 0] + jnp.asarray(ml)[:, None] * cw_l[..., 0]
        w_i = jnp.asarray(mg)[:, None] * cw_g[..., 1] + jnp.asarray(ml)[:, None] * cw_l[..., 1]
        union = (mg + ml) > 0
    elif fm == 'G':
        m = band_mask_np(F, *bounds['G'])
        w_r = jnp.asarray(m)[:, None] * cw[..., 0]
        w_i = jnp.asarray(m)[:, None] * cw[..., 1]
        union = m > 0
    else:  # 'L'
        m = band_mask_np(F, *bounds['L'])
        w_r = jnp.asarray(m)[:, None] * cw[..., 0]
        w_i = jnp.asarray(m)[:, None] * cw[..., 1]
        union = m > 0

    # Prune frequencies whose band mask is zero everywhere (dead work in the
    # spectral matmuls), then pad the kept set to a sublane multiple.
    keep = np.nonzero(union)[0]
    if keep.size == 0:
        keep = np.array([0])
    fcat, bcat, fk_pad = build_spectral_operator(seq, keep)
    pad = fk_pad - keep.size
    wr_k = jnp.pad(w_r[keep], ((0, pad), (0, 0)))
    wi_k = jnp.pad(w_i[keep], ((0, pad), (0, 0)))

    return {
        # kernel-side (pruned / padded)
        'fcat': fcat, 'bcat': bcat, 'fk_pad': fk_pad,
        'wr': wr_k, 'wi': wi_k,
        'ln_g': jnp.ones((1, hidden), jnp.float32),
        'ln_b': jnp.zeros((1, hidden), jnp.float32),
        # reference-side (full F, masks folded in)
        'w_eff_r': w_r, 'w_eff_i': w_i,
    }


# ----------------------------- forward (single pallas_call) --------------------
def pick_batch_block(batch, seq, target_rows=256):
    """Largest divisor of `batch` whose rows-per-block (b*S) stay within the MXU
    target; never splits small batches across extra grid steps (review 1 & 6)."""
    cap = max(1, target_rows // seq)
    for cand in range(min(batch, cap), 0, -1):
        if batch % cand == 0:
            return cand
    return 1


def filter_mixer_forward(x, params, *, residual=True):
    B, S, H = x.shape
    fk_pad = params['fk_pad']
    b_blk = pick_batch_block(B, S)
    nb = B // b_blk

    kernel = functools.partial(filter_mixer_kernel, fk=fk_pad, residual=residual)
    return pl.pallas_call(
        kernel,
        out_shape=jax.ShapeDtypeStruct((B, S, H), jnp.float32),
        grid=(nb,),
        in_specs=[
            pl.BlockSpec((b_blk, S, H), lambda i: (i, 0, 0)),          # x
            pl.BlockSpec(params['fcat'].shape, lambda i: (0, 0)),      # [Fr; Fi]
            pl.BlockSpec(params['bcat'].shape, lambda i: (0, 0)),      # [Br | Bi]
            pl.BlockSpec(params['wr'].shape, lambda i: (0, 0)),        # Re(W)
            pl.BlockSpec(params['wi'].shape, lambda i: (0, 0)),        # Im(W)
            pl.BlockSpec(params['ln_g'].shape, lambda i: (0, 0)),      # LN gamma
            pl.BlockSpec(params['ln_b'].shape, lambda i: (0, 0)),      # LN beta
        ],
        out_specs=pl.BlockSpec((b_blk, S, H), lambda i: (i, 0, 0)),
        compiler_params=pltpu.CompilerParams(
            dimension_semantics=("parallel",),       # megacore split when nb > 1
            vmem_limit_bytes=32 * 1024 * 1024),
    )(x, params['fcat'], params['bcat'], params['wr'], params['wi'],
      params['ln_g'], params['ln_b'])


# ----------------------------- pure-JAX reference ------------------------------
def filter_mixer_ref(x, params, *, residual=True):
    X = jnp.fft.rfft(x, axis=1, norm='ortho')
    W = (params['w_eff_r'] + 1j * params['w_eff_i'])[None]   # band masks folded in
    y = jnp.fft.irfft(X * W, n=x.shape[1], axis=1, norm='ortho')
    h = y + x if residual else y
    return layernorm(h, params['ln_g'], params['ln_b'])


# ----------------------------- main --------------------------------------------
if __name__ == "__main__":
    key = jax.random.PRNGKey(0)
    k_in, k_params = jax.random.split(key)
    x = jax.random.normal(k_in, (BATCH, SEQ, HIDDEN), jnp.float32)
    params = make_params(k_params, LAYER_INDEX, CONFIG, HIDDEN)

    out = jax.block_until_ready(
        filter_mixer_forward(x, params, residual=CONFIG['residual']))

    ref = filter_mixer_ref(x, params, residual=CONFIG['residual'])
    err = float(jnp.max(jnp.abs(ref - out)))
    # bf16 MXU operands (review item 4) set this tolerance; an f32 feed of the
    # same kernel matches to ~1e-6.
    assert err < 1e-2, f"max abs error too large: {err}"

    print("KERNEL_OK")
</pallas_src>

<mosaic_0001>
module attributes {stable_mosaic.version = 11 : i64} {
  func.func @filter_mixer_kernel(%arg0: i32, %arg1: memref<2x8x32xf32, #tpu.memory_space<vmem>>, %arg2: memref<16x8xbf16, #tpu.memory_space<vmem>>, %arg3: memref<8x16xbf16, #tpu.memory_space<vmem>>, %arg4: memref<8x32xf32, #tpu.memory_space<vmem>>, %arg5: memref<8x32xf32, #tpu.memory_space<vmem>>, %arg6: memref<1x32xf32, #tpu.memory_space<vmem>>, %arg7: memref<1x32xf32, #tpu.memory_space<vmem>>, %arg8: memref<2x8x32xf32, #tpu.memory_space<vmem>>) attributes {dimension_semantics = [#tpu.dimension_semantics<parallel>], iteration_bounds = array<i64: 1>, scalar_prefetch = 0 : i64, scratch_operands = 0 : i64, tpu.core_type = #tpu.core_type<tc>, window_params = [{transform_indices = @transform_0, window_bounds = array<i64: 2, 8, 32>}, {pipeline_mode = #tpu.pipeline_mode<synchronous>, transform_indices = @transform_1, window_bounds = array<i64: 16, 8>}, {pipeline_mode = #tpu.pipeline_mode<synchronous>, transform_indices = @transform_2, window_bounds = array<i64: 8, 16>}, {pipeline_mode = #tpu.pipeline_mode<synchronous>, transform_indices = @transform_3, window_bounds = array<i64: 8, 32>}, {pipeline_mode = #tpu.pipeline_mode<synchronous>, transform_indices = @transform_4, window_bounds = array<i64: 8, 32>}, {pipeline_mode = #tpu.pipeline_mode<synchronous>, transform_indices = @transform_5, window_bounds = array<i64: 1, 32>}, {pipeline_mode = #tpu.pipeline_mode<synchronous>, transform_indices = @transform_6, window_bounds = array<i64: 1, 32>}, {transform_indices = @transform_7, window_bounds = array<i64: 2, 8, 32>}]} {
    %c0 = arith.constant 0 : index
    %c0_0 = arith.constant 0 : index
    %0 = vector.load %arg2[%c0, %c0_0] : memref<16x8xbf16, #tpu.memory_space<vmem>>, vector<16x8xbf16>
    %c0_1 = arith.constant 0 : index
    %c0_2 = arith.constant 0 : index
    %1 = vector.load %arg3[%c0_1, %c0_2] : memref<8x16xbf16, #tpu.memory_space<vmem>>, vector<8x16xbf16>
    %c0_3 = arith.constant 0 : index
    %c0_4 = arith.constant 0 : index
    %2 = vector.load %arg4[%c0_3, %c0_4] : memref<8x32xf32, #tpu.memory_space<vmem>>, vector<8x32xf32>
    %c0_5 = arith.constant 0 : index
    %c0_6 = arith.constant 0 : index
    %3 = vector.load %arg5[%c0_5, %c0_6] : memref<8x32xf32, #tpu.memory_space<vmem>>, vector<8x32xf32>
    %c0_7 = arith.constant 0 : index
    %c0_8 = arith.constant 0 : index
    %4 = vector.load %arg6[%c0_7, %c0_8] : memref<1x32xf32, #tpu.memory_space<vmem>>, vector<1x32xf32>
    %c0_9 = arith.constant 0 : index
    %c0_10 = arith.constant 0 : index
    %5 = vector.load %arg7[%c0_9, %c0_10] : memref<1x32xf32, #tpu.memory_space<vmem>>, vector<1x32xf32>
    %c0_11 = arith.constant 0 : index
    %c0_12 = arith.constant 0 : index
    %c0_13 = arith.constant 0 : index
    %6 = vector.load %arg1[%c0_11, %c0_12, %c0_13] : memref<2x8x32xf32, #tpu.memory_space<vmem>>, vector<1x8x32xf32>
    %7 = vector.shape_cast %6 : vector<1x8x32xf32> to vector<8x32xf32>
    %8 = arith.truncf %7 : vector<8x32xf32> to vector<8x32xbf16>
    %cst = arith.constant dense<0.000000e+00> : vector<16x32xf32>
    %9 = tpu.matmul %0, %8, %cst {dimension_numbers = #tpu.dot_dimension_numbers<[1], [0], [0], [1], [0, 0, 1, 1], [], []>} : vector<16x8xbf16>, vector<8x32xbf16>, vector<16x32xf32> -> vector<16x32xf32>
    %10 = vector.extract_strided_slice %9 {offsets = [0, 0], sizes = [8, 32], strides = [1, 1]} : vector<16x32xf32> to vector<8x32xf32>
    %11 = vector.extract_strided_slice %9 {offsets = [8, 0], sizes = [8, 32], strides = [1, 1]} : vector<16x32xf32> to vector<8x32xf32>
    %12 = arith.mulf %2, %10 : vector<8x32xf32>
    %13 = arith.mulf %3, %11 : vector<8x32xf32>
    %14 = arith.subf %12, %13 : vector<8x32xf32>
    %15 = arith.mulf %3, %10 : vector<8x32xf32>
    %16 = arith.mulf %2, %11 : vector<8x32xf32>
    %17 = arith.addf %15, %16 : vector<8x32xf32>
    %18 = tpu.concatenate %14, %17 in 0 : vector<8x32xf32>, vector<8x32xf32> -> vector<16x32xf32>
    %19 = arith.truncf %18 : vector<16x32xf32> to vector<16x32xbf16>
    %cst_14 = arith.constant dense<0.000000e+00> : vector<8x32xf32>
    %20 = tpu.matmul %1, %19, %cst_14 {dimension_numbers = #tpu.dot_dimension_numbers<[1], [0], [0], [1], [0, 0, 1, 1], [], []>} : vector<8x16xbf16>, vector<16x32xbf16>, vector<8x32xf32> -> vector<8x32xf32>
    %21 = arith.addf %20, %7 : vector<8x32xf32>
    %cst_15 = arith.constant dense<0.000000e+00> : vector<8xf32>
    %22 = vector.multi_reduction <add>, %21, %cst_15 [1] : vector<8x32xf32> to vector<8xf32>
    %23 = vector.shape_cast %22 : vector<8xf32> to vector<8x1xf32>
    %cst_16 = arith.constant 3.200000e+01 : f32
    %24 = vector.broadcast %cst_16 : f32 to vector<8x1xf32>
    %25 = arith.divf %23, %24 : vector<8x1xf32>
    %26 = vector.broadcast %25 : vector<8x1xf32> to vector<8x32xf32>
    %27 = arith.subf %21, %26 : vector<8x32xf32>
    %28 = arith.mulf %27, %27 : vector<8x32xf32>
    %cst_17 = arith.constant dense<0.000000e+00> : vector<8xf32>
    %29 = vector.multi_reduction <add>, %28, %cst_17 [1] : vector<8x32xf32> to vector<8xf32>
    %30 = vector.shape_cast %29 : vector<8xf32> to vector<8x1xf32>
    %cst_18 = arith.constant 3.200000e+01 : f32
    %31 = vector.broadcast %cst_18 : f32 to vector<8x1xf32>
    %32 = arith.divf %30, %31 : vector<8x1xf32>
    %33 = vector.broadcast %25 : vector<8x1xf32> to vector<8x32xf32>
    %34 = arith.subf %21, %33 : vector<8x32xf32>
    %cst_19 = arith.constant 9.99999996E-13 : f32
    %35 = vector.broadcast %cst_19 : f32 to vector<8x1xf32>
    %36 = arith.addf %32, %35 : vector<8x1xf32>
    %37 = math.rsqrt %36 : vector<8x1xf32>
    %38 = vector.broadcast %37 : vector<8x1xf32> to vector<8x32xf32>
    %39 = arith.mulf %34, %38 : vector<8x32xf32>
    %40 = vector.broadcast %4 : vector<1x32xf32> to vector<8x32xf32>
    %41 = arith.mulf %39, %40 : vector<8x32xf32>
    %42 = vector.broadcast %5 : vector<1x32xf32> to vector<8x32xf32>
    %43 = arith.addf %41, %42 : vector<8x32xf32>
    %c0_20 = arith.constant 0 : index
    %c0_21 = arith.constant 0 : index
    %c0_22 = arith.constant 0 : index
    %44 = vector.load %arg8[%c0_20, %c0_21, %c0_22] : memref<2x8x32xf32, #tpu.memory_space<vmem>>, vector<1x8x32xf32>
    %45 = vector.shape_cast %44 : vector<1x8x32xf32> to vector<8x32xf32>
    %46 = vector.shape_cast %43 : vector<8x32xf32> to vector<1x8x32xf32>
    tpu.vector_store %arg8[%c0_20, %c0_21, %c0_22], %46 {strides = array<i32>} : memref<2x8x32xf32, #tpu.memory_space<vmem>>, vector<1x8x32xf32>,
    %c1 = arith.constant 1 : index
    %c0_23 = arith.constant 0 : index
    %c0_24 = arith.constant 0 : index
    %47 = vector.load %arg1[%c1, %c0_23, %c0_24] : memref<2x8x32xf32, #tpu.memory_space<vmem>>, vector<1x8x32xf32>
    %48 = vector.shape_cast %47 : vector<1x8x32xf32> to vector<8x32xf32>
    %49 = arith.truncf %48 : vector<8x32xf32> to vector<8x32xbf16>
    %cst_25 = arith.constant dense<0.000000e+00> : vector<16x32xf32>
    %50 = tpu.matmul %0, %49, %cst_25 {dimension_numbers = #tpu.dot_dimension_numbers<[1], [0], [0], [1], [0, 0, 1, 1], [], []>} : vector<16x8xbf16>, vector<8x32xbf16>, vector<16x32xf32> -> vector<16x32xf32>
    %51 = vector.extract_strided_slice %50 {offsets = [0, 0], sizes = [8, 32], strides = [1, 1]} : vector<16x32xf32> to vector<8x32xf32>
    %52 = vector.extract_strided_slice %50 {offsets = [8, 0], sizes = [8, 32], strides = [1, 1]} : vector<16x32xf32> to vector<8x32xf32>
    %53 = arith.mulf %2, %51 : vector<8x32xf32>
    %54 = arith.mulf %3, %52 : vector<8x32xf32>
    %55 = arith.subf %53, %54 : vector<8x32xf32>
    %56 = arith.mulf %3, %51 : vector<8x32xf32>
    %57 = arith.mulf %2, %52 : vector<8x32xf32>
    %58 = arith.addf %56, %57 : vector<8x32xf32>
    %59 = tpu.concatenate %55, %58 in 0 : vector<8x32xf32>, vector<8x32xf32> -> vector<16x32xf32>
    %60 = arith.truncf %59 : vector<16x32xf32> to vector<16x32xbf16>
    %cst_26 = arith.constant dense<0.000000e+00> : vector<8x32xf32>
    %61 = tpu.matmul %1, %60, %cst_26 {dimension_numbers = #tpu.dot_dimension_numbers<[1], [0], [0], [1], [0, 0, 1, 1], [], []>} : vector<8x16xbf16>, vector<16x32xbf16>, vector<8x32xf32> -> vector<8x32xf32>
    %62 = arith.addf %61, %48 : vector<8x32xf32>
    %cst_27 = arith.constant dense<0.000000e+00> : vector<8xf32>
    %63 = vector.multi_reduction <add>, %62, %cst_27 [1] : vector<8x32xf32> to vector<8xf32>
    %64 = vector.shape_cast %63 : vector<8xf32> to vector<8x1xf32>
    %cst_28 = arith.constant 3.200000e+01 : f32
    %65 = vector.broadcast %cst_28 : f32 to vector<8x1xf32>
    %66 = arith.divf %64, %65 : vector<8x1xf32>
    %67 = vector.broadcast %66 : vector<8x1xf32> to vector<8x32xf32>
    %68 = arith.subf %62, %67 : vector<8x32xf32>
    %69 = arith.mulf %68, %68 : vector<8x32xf32>
    %cst_29 = arith.constant dense<0.000000e+00> : vector<8xf32>
    %70 = vector.multi_reduction <add>, %69, %cst_29 [1] : vector<8x32xf32> to vector<8xf32>
    %71 = vector.shape_cast %70 : vector<8xf32> to vector<8x1xf32>
    %cst_30 = arith.constant 3.200000e+01 : f32
    %72 = vector.broadcast %cst_30 : f32 to vector<8x1xf32>
    %73 = arith.divf %71, %72 : vector<8x1xf32>
    %74 = vector.broadcast %66 : vector<8x1xf32> to vector<8x32xf32>
    %75 = arith.subf %62, %74 : vector<8x32xf32>
    %cst_31 = arith.constant 9.99999996E-13 : f32
    %76 = vector.broadcast %cst_31 : f32 to vector<8x1xf32>
    %77 = arith.addf %73, %76 : vector<8x1xf32>
    %78 = math.rsqrt %77 : vector<8x1xf32>
    %79 = vector.broadcast %78 : vector<8x1xf32> to vector<8x32xf32>
    %80 = arith.mulf %75, %79 : vector<8x32xf32>
    %81 = vector.broadcast %4 : vector<1x32xf32> to vector<8x32xf32>
    %82 = arith.mulf %80, %81 : vector<8x32xf32>
    %83 = vector.broadcast %5 : vector<1x32xf32> to vector<8x32xf32>
    %84 = arith.addf %82, %83 : vector<8x32xf32>
    %c1_32 = arith.constant 1 : index
    %c0_33 = arith.constant 0 : index
    %c0_34 = arith.constant 0 : index
    %85 = vector.load %arg8[%c1_32, %c0_33, %c0_34] : memref<2x8x32xf32, #tpu.memory_space<vmem>>, vector<1x8x32xf32>
    %86 = vector.shape_cast %85 : vector<1x8x32xf32> to vector<8x32xf32>
    %87 = vector.shape_cast %84 : vector<8x32xf32> to vector<1x8x32xf32>
    tpu.vector_store %arg8[%c1_32, %c0_33, %c0_34], %87 {strides = array<i32>} : memref<2x8x32xf32, #tpu.memory_space<vmem>>, vector<1x8x32xf32>,
    return
  }
  func.func @transform_0(%arg0: i32) -> (i32, i32, i32) {
    %c0_i32 = arith.constant 0 : i32
    %c0_i32_0 = arith.constant 0 : i32
    %c0_i32_1 = arith.constant 0 : i32
    return %arg0, %c0_i32, %c0_i32_0 : i32, i32, i32
  }
  func.func @transform_1(%arg0: i32) -> (i32, i32) {
    %c0_i32 = arith.constant 0 : i32
    %c0_i32_0 = arith.constant 0 : i32
    %c0_i32_1 = arith.constant 0 : i32
    return %c0_i32, %c0_i32_0 : i32, i32
  }
  func.func @transform_2(%arg0: i32) -> (i32, i32) {
    %c0_i32 = arith.constant 0 : i32
    %c0_i32_0 = arith.constant 0 : i32
    %c0_i32_1 = arith.constant 0 : i32
    return %c0_i32, %c0_i32_0 : i32, i32
  }
  func.func @transform_3(%arg0: i32) -> (i32, i32) {
    %c0_i32 = arith.constant 0 : i32
    %c0_i32_0 = arith.constant 0 : i32
    %c0_i32_1 = arith.constant 0 : i32
    return %c0_i32, %c0_i32_0 : i32, i32
  }
  func.func @transform_4(%arg0: i32) -> (i32, i32) {
    %c0_i32 = arith.constant 0 : i32
    %c0_i32_0 = arith.constant 0 : i32
    %c0_i32_1 = arith.constant 0 : i32
    return %c0_i32, %c0_i32_0 : i32, i32
  }
  func.func @transform_5(%arg0: i32) -> (i32, i32) {
    %c0_i32 = arith.constant 0 : i32
    %c0_i32_0 = arith.constant 0 : i32
    %c0_i32_1 = arith.constant 0 : i32
    return %c0_i32, %c0_i32_0 : i32, i32
  }
  func.func @transform_6(%arg0: i32) -> (i32, i32) {
    %c0_i32 = arith.constant 0 : i32
    %c0_i32_0 = arith.constant 0 : i32
    %c0_i32_1 = arith.constant 0 : i32
    return %c0_i32, %c0_i32_0 : i32, i32
  }
  func.func @transform_7(%arg0: i32) -> (i32, i32, i32) {
    %c0_i32 = arith.constant 0 : i32
    %c0_i32_0 = arith.constant 0 : i32
    %c0_i32_1 = arith.constant 0 : i32
    return %arg0, %c0_i32, %c0_i32_0 : i32, i32, i32
  }
}

</mosaic_0001>

<bundles_post_ra>
// kernel: tpu_custom_call.1
= control target key start
LH: loop header
LB: loop body
LE: loop exit
PB: predicated region body
PF: predicated region fallthrough
CT: control target
= control target key end

     0   :  { %12 = vsyncpa [#allocation3], 0  ;;  %s426_s0 = inlined_call_operand.hbm [shape: f32[2,8,32], index: 0, kind: input, shape index: {}]   ;;  %s427_s1 = inlined_call_operand.vmem [shape: bf16[16,8], index: 1, kind: input, shape index: {}]   ;;  %s428_s2 = inlined_call_operand.vmem [shape: bf16[8,16], index: 2, kind: input, shape index: {}]   ;;  %s429_s3 = inlined_call_operand.vmem [shape: f32[8,32], index: 3, kind: input, shape index: {}]   ;;  %s430_s4 = inlined_call_operand.hbm [shape: f32[8,32], index: 4, kind: input, shape index: {}]   ;;  %s431_s5 = inlined_call_operand.vmem [shape: f32[1,32], index: 5, kind: input, shape index: {}]   ;;  %s432_s6 = inlined_call_operand.vmem [shape: f32[1,32], index: 6, kind: input, shape index: {}]   ;;  %s433_s7 = inlined_call_operand.hbm [shape: f32[2,8,32], index: 7, kind: output, shape index: {}]  }
   0x1   :  { %13 = vsyncpa [#allocation6], 0 }
   0x2   :  { %14 = vsyncpa [#allocation4], 0  ;;  %s19_s26 = sshll.u32 %s426_s0, 4  ;;  %s344_s27 = smov [#allocation2]   ;;  %s20_s26 = int_to_ptr.hbm [resolvable:$true] %s19_s26 }
   0x3   :  { %s21_s28 = sshll.u32 %s344_s27, 4  ;;  %s39_s8 = sshll.u32 %s430_s4, 4  ;;  %s22_s28 = int_to_ptr.vmem [resolvable:$true] %s21_s28  ;;  %s40_s8 = int_to_ptr.hbm [resolvable:$true] %s39_s8 }
   0x4   :  { %s345_s9 = smov 128   ;;  %s346_s10 = smov 8  }
   0x5   :  { %27 = dma.hbm_to_vmem [thread:$0]  %s20_s26, 256, %s22_s28, [#allocation3], %s345_s9, %s345_s9, %s346_s10  }
   0x6   :  { %s347_s11 = smov [#allocation5]  }
   0x7   :  { %s41_s12 = sshll.u32 %s347_s11, 4  ;;  %s42_s12 = int_to_ptr.vmem [resolvable:$true] %s41_s12 }
   0x8   :  { %44 = dma.hbm_to_vmem [thread:$0]  %s40_s8, 128, %s42_s12, [#allocation6]  }
   0x9   :  { %338 = dma.done.wait [#allocation3], 256  }
   0xa   :  { %339 = vsyncadd [#allocation3], 4294967040 }
   0xb   :  { %340 = dma.done.wait [#allocation6], 128  }
   0xc   :  { %341 = vsyncadd [#allocation6], 4294967168  ;;  %v65_v0 = vld [vmem:[#allocation2] sm:$0xff]  ;;  %vm76_vm0 = vcmask 1043456   ;;  %v158_v1 = vld [vmem:[#allocation2 + $0x8] sm:$0xff]  ;;  %vm72_vm1 = vcmask 64512  }
   0xd   :  { %v66_v2 = vpack.c.bf16 %v65_v0, %v65_v0  ;;  %v159_v3 = vpack.c.bf16 %v158_v1, %v158_v1  ;;  %v251_v6 = vld [vmem:[%s427_s1] sm:$0xff]  ;;  %v62_v9 = vld [vmem:[#allocation5] sm:$0xff]  ;;  %vm101_vm2 = vcmask 130048   ;;  %vm118_vm3 = vcmask 261120  }
   0xe   :  { %v61_v8 = vld [vmem:[%s429_s3] sm:$0xff]  ;;  %v348_v36 = vmov 32.0  }
   0xf   :  { %v78_v4 = vsel %vm76_vm0, %v66_v2, 0  ;;  %v161_v5 = vsel %vm76_vm0, %v159_v3, 0  ;;  %v60_v24 = vld [vmem:[%s428_s2] sm:$0xf]  ;;  %260 = vrcp.f32 %v348_v36 }
  0x10   :  { %87 = vmatpush.bf16.msra.mxu0 %v78_v4  ;;  %170 = vmatpush.bf16.msra.mxu2 %v161_v5  ;;  %v259_v5 = vld [vmem:[%s432_s6] ss:$0 sm:$0xff]  ;;  %s229_s6 = sshll.u32 %s433_s7, 4  ;;  %s230_s6 = int_to_ptr.hbm [resolvable:$true] %s229_s6 }
  0x13   :  { %247 = vmatmul.msk.bf16.vlgmr.msra.gmra.mxu0 %vm72_vm1, %v251_v6  ;;  %249 = vmatmul.msk.bf16.vlgmr.msra.gmra.mxu2 %vm72_vm1, %v251_v6 }
  0x15   :  { %v261_v37 = vpop.eup %260 }
  0x16   :  { %v123_v38 = vmul.f32 32.0, %v261_v37  ;;  %vm127_vm4 = vweird.f32 %v261_v37 }
  0x18   :  { %v124_v39 = vsub.f32 1.0, %v123_v38 }
  0x1a   :  { %v125_v40 = vmul.f32 %v261_v37, %v124_v39 }
  0x1c   :  { %v126_v41 = vadd.f32 %v261_v37, %v125_v40 }
  0x1e   :  { %v128_v42 = vsel %vm127_vm4, %v261_v37, %v126_v41 }
  0x90   :  { %v89_v7 = vpop.f32.mrf.mxu0 }
  0x91   :  { %v94_v12 = vmul.f32 %v89_v7, %v61_v8  ;;  %v97_v13 = vmul.f32 %v89_v7, %v62_v9 }
  0x96   :  { %v172_v10 = vpop.f32.mrf.mxu2 }
  0x97   :  { %v177_v20 = vmul.f32 %v172_v10, %v61_v8  ;;  %v180_v21 = vmul.f32 %v172_v10, %v62_v9 }
  0x98   :  { %v91_v11 = vpop.f32.mrf.mxu0 }
  0x99   :  { %v95_v14 = vmul.f32 %v91_v11, %v62_v9  ;;  %v98_v15 = vmul.f32 %v91_v11, %v61_v8 }
  0x9b   :  { %v96_v16 = vsub.f32 %v94_v12, %v95_v14  ;;  %v99_v17 = vadd.f32 %v98_v15, %v97_v13 }
  0x9d   :  { %v100_v18 = vpack.c.bf16 %v99_v17, %v96_v16 }
  0x9e   :  { %v174_v19 = vpop.f32.mrf.mxu2 }
  0x9f   :  { %v178_v22 = vmul.f32 %v174_v19, %v62_v9  ;;  %v181_v23 = vmul.f32 %v174_v19, %v61_v8  ;;  %112 = vmatpush.bf16.msra.mxu1 %v100_v18 }
  0xa1   :  { %v179_v25 = vsub.f32 %v177_v20, %v178_v22  ;;  %v182_v26 = vadd.f32 %v181_v23, %v180_v21 }
  0xa2   :  { %248 = vmatmul.msk.bf16.vlgmr.msra.gmra.mxu1 %vm101_vm2, %v60_v24 }
  0xa3   :  { %v183_v27 = vpack.c.bf16 %v182_v26, %v179_v25 }
  0xa5   :  { %191 = vmatpush.bf16.msra.mxu3 %v183_v27 }
  0xa8   :  { %250 = vmatmul.msk.bf16.vlgmr.msra.gmra.mxu3 %vm101_vm2, %v60_v24 }
 0x11f   :  { %v114_v28 = vpop.f32.mrf.mxu1 }
 0x120   :  { %v115_v29 = vadd.f32 %v114_v28, %v65_v0 }
 0x122   :  { %v119_v30 = vsel %vm118_vm3, %v115_v29, 0.0 }
 0x123   :  { %120 = vadd.xlane.f32.xlu0 %v119_v30 }
 0x127   :  { %v116_v31 = vpop.f32.mrf.mxu1 }
 0x12b   :  { %v193_v32 = vpop.f32.mrf.mxu3 }
 0x12c   :  { %v194_v33 = vadd.f32 %v193_v32, %v158_v1  ;;  %v258_v1 = vld [vmem:[%s431_s5] ss:$0 sm:$0xff]  ;;  %s349_s5 = smov [#allocation7]  }
 0x12d   :  { %s227_s18 = sshll.u32 %s349_s5, 4  ;;  %s228_s18 = int_to_ptr.vmem [resolvable:$true] %s227_s18 }
 0x12e   :  { %v197_v34 = vsel %vm118_vm3, %v194_v33, 0.0 }
 0x12f   :  { %198 = vadd.xlane.f32.xlu0 %v197_v34 }
 0x133   :  { %v195_v35 = vpop.f32.mrf.mxu3 }
 0x196   :  { %v121_v43 = vpop.xlane.xlu0 %120 }
 0x197   :  { %v129_v44 = vmul.f32 %v128_v42, %v121_v43 }
 0x199   :  { %v130_v45 = vsub.f32 %v115_v29, %v129_v44 }
 0x19b   :  { %v131_v46 = vmul.f32 %v130_v45, %v130_v45 }
 0x19d   :  { %v132_v47 = vsel %vm118_vm3, %v131_v46, 0.0 }
 0x19e   :  { %133 = vadd.xlane.f32.xlu1 %v132_v47 }
 0x1a2   :  { %v199_v48 = vpop.xlane.xlu0 %198 }
 0x1a3   :  { %v200_v49 = vmul.f32 %v199_v48, %v128_v42 }
 0x1a5   :  { %v201_v50 = vsub.f32 %v194_v33, %v200_v49 }
 0x1a7   :  { %v202_v51 = vmul.f32 %v201_v50, %v201_v50 }
 0x1a9   :  { %v203_v52 = vsel %vm118_vm3, %v202_v51, 0.0 }
 0x1aa   :  { %204 = vadd.xlane.f32.xlu1 %v203_v52 }
 0x211   :  { %v134_v53 = vpop.xlane.xlu1 %133 }
 0x212   :  { %v135_v54 = vmul.f32 %v134_v53, %v128_v42 }
 0x214   :  { %v136_v55 = vadd.f32 1e-12, %v135_v54 }
 0x216   :  { %262 = vrsqrt.f32 %v136_v55  ;;  %vm143_vm6 = vweird.f32 %v136_v55 }
 0x21c   :  { %v263_v56 = vpop.eup %262 }
 0x21d   :  { %v138_v57 = vmul.f32 %v263_v56, %v136_v55  ;;  %v205_v58 = vpop.xlane.xlu1 %204  ;;  %vm144_vm5 = vweird.f32 %v263_v56 }
 0x21e   :  { %v206_v59 = vmul.f32 %v205_v58, %v128_v42  ;;  %vm145_vm7 = vmor %vm143_vm6, %vm144_vm5 }
 0x21f   :  { %v139_v60 = vmul.f32 %v263_v56, %v138_v57 }
 0x220   :  { %v207_v61 = vadd.f32 1e-12, %v206_v59 }
 0x221   :  { %v140_v62 = vmul.f32 0.5, %v139_v60 }
 0x222   :  { %264 = vrsqrt.f32 %v207_v61  ;;  %vm214_vm9 = vweird.f32 %v207_v61 }
 0x223   :  { %v141_v63 = vsub.f32 1.5, %v140_v62 }
 0x225   :  { %v142_v0 = vmul.f32 %v263_v56, %v141_v63 }
 0x227   :  { %v146_v2 = vsel %vm145_vm7, %v263_v56, %v142_v0 }
 0x228   :  { %v265_v3 = vpop.eup %264  ;;  %v147_v4 = vmul.f32 %v146_v2, %v130_v45 }
 0x229   :  { %v209_v6 = vmul.f32 %v265_v3, %v207_v61  ;;  %vm215_vm8 = vweird.f32 %v265_v3 }
 0x22a   :  { %v151_v7 = vmul.f32 %v258_v1, %v147_v4  ;;  %vm216_vm10 = vmor %vm214_vm9, %vm215_vm8 }
 0x22b   :  { %v210_v8 = vmul.f32 %v265_v3, %v209_v6 }
 0x22c   :  { %v155_v9 = vadd.f32 %v259_v5, %v151_v7 }
 0x22d   :  { %v211_v10 = vmul.f32 0.5, %v210_v8 }
 0x22e   :  { %156 = vst.msk [vmem:[#allocation7] sm:$0xff] %vm118_vm3, %v155_v9 }
 0x22f   :  { %v212_v11 = vsub.f32 1.5, %v211_v10 }
 0x231   :  { %v213_v12 = vmul.f32 %v265_v3, %v212_v11 }
 0x233   :  { %v217_v13 = vsel %vm216_vm10, %v265_v3, %v213_v12 }
 0x234   :  { %v218_v14 = vmul.f32 %v217_v13, %v201_v50 }
 0x236   :  { %v219_v15 = vmul.f32 %v258_v1, %v218_v14 }
 0x238   :  { %v220_v16 = vadd.f32 %v259_v5, %v219_v15 }
 0x23a   :  { %222 = vst.msk [vmem:[#allocation7 + $0x8] sm:$0xff] %vm118_vm3, %v220_v16 }
 0x23b   :  { %235 = dma.vmem_to_hbm [thread:$0]  %s228_s18, 256, %s230_s6, [#allocation4], %s345_s9, %s345_s9, %s346_s10  }
 0x23c   :  { %342 = dma.done.wait [#allocation4], 256  }
 0x23d   :  { %343 = vsyncadd [#allocation4], 4294967040 }
 0x23e   :  { %240 = vsyncpa [#allocation3], 1 }
 0x23f   :  { %241 = vsyncpa [#allocation6], 1 }
 0x240   :  { %242 = vsyncpa [#allocation4], 1 }

</bundles_post_ra>
